<compile_context>
chip_gen: v7x
topology: tpu7x:2x2x1
jax: 0.10.0
libtpu: 0.0.40
codegen_flags: <defaults>
</compile_context>

<pallas_src>
import jax
import jax.numpy as jnp
import numpy as np
from jax import lax
from jax.experimental import pallas as pl
from jax.experimental.pallas import tpu as pltpu


def _round_up(a, b):
    return ((a + b - 1) // b) * b


def _pick_tile(dim, pref, granule):
    # Use the preferred tile for large dims; for small dims use the whole
    # (granule-rounded) extent so block shapes stay (8,128)-legal.
    return pref if dim >= pref else _round_up(dim, granule)


def _linear_kernel(x_ref, w_ref, b_ref, o_ref, acc_ref):
    # x_ref  : (tm, tk)  flattened input rows
    # w_ref  : (tn, tk)  weight rows in PyTorch layout (in_channels, out_channels),
    #                    contracted on the LAST dim -> no wrapper transpose needed.
    # b_ref  : (1, tn)   bias row (f32), broadcast over tm
    # o_ref  : (tm, tn)  output tile
    # acc_ref: (tm, tn)  f32 accumulator, resident across the k (reduction) axis
    k = pl.program_id(2)

    @pl.when(k == 0)
    def _():
        acc_ref[...] = jnp.zeros_like(acc_ref)

    acc_ref[...] += lax.dot_general(
        x_ref[...], w_ref[...],
        dimension_numbers=(((1,), (1,)), ((), ())),   # contract x[:, k] with w[:, k]
        preferred_element_type=jnp.float32)

    @pl.when(k == pl.num_programs(2) - 1)
    def _():
        # Bias added exactly once, in the finalize branch.
        o_ref[...] = (acc_ref[...] + b_ref[...]).astype(o_ref.dtype)


def linear_pallas(x, weight, bias, *, tm=256, tn=256, tk=512):
    """out = x @ weight.T + bias   (exact PyTorch `Linear.forward` semantics)."""
    orig_shape = x.shape
    H = orig_shape[-1]                                  # = out_channels in the formula
    M = int(np.prod(orig_shape[:-1])) if len(orig_shape) > 1 else 1
    C, Hw = weight.shape                                # (in_channels, out_channels)
    assert H == Hw, "last dim of x must equal out_channels (x.matmul(weight.t()))"
    assert bias.shape[-1] == C, (
        "bias broadcast requires in_channels == out_channels (as in the reference)")

    # Tile sizes: clamp for small problems, keep lanes dense (multiples of 128)
    # for tn/tk and sublane-aligned (multiple of 8) for tm.  The defaults
    # (256, 256, 512) are 128/256-aligned for the v5e/v6e/v7x MXUs and fit
    # easily in scoped VMEM when double-buffered.
    tm = _pick_tile(M, tm, 8)
    tn = _pick_tile(C, tn, 128)
    tk = _pick_tile(H, tk, 128)

    Mp, Cp, Hp = _round_up(M, tm), _round_up(C, tn), _round_up(H, tk)

    x2 = x.reshape(M, H)
    if (Mp, Hp) != (M, H):
        x2 = jnp.pad(x2, ((0, Mp - M), (0, Hp - H)))
    w = weight
    if (Cp, Hp) != (C, H):
        w = jnp.pad(w, ((0, Cp - C), (0, Hp - H)))
    b2 = jnp.reshape(bias.astype(jnp.float32), (1, C))
    if Cp != C:
        b2 = jnp.pad(b2, ((0, 0), (0, Cp - C)))

    grid = (Mp // tm, Cp // tn, Hp // tk)               # reduction axis (k) last

    out = pl.pallas_call(
        _linear_kernel,
        out_shape=jax.ShapeDtypeStruct((Mp, Cp), x.dtype),
        grid=grid,
        in_specs=[
            pl.BlockSpec((tm, tk), lambda i, j, k: (i, k)),   # x rows
            pl.BlockSpec((tn, tk), lambda i, j, k: (j, k)),   # weight rows (no transpose)
            pl.BlockSpec((1, tn), lambda i, j, k: (0, j)),    # bias row
        ],
        out_specs=pl.BlockSpec((tm, tn), lambda i, j, k: (i, j)),
        scratch_shapes=[pltpu.VMEM((tm, tn), jnp.float32)],
        compiler_params=pltpu.CompilerParams(
            dimension_semantics=("parallel", "parallel", "arbitrary"),
        ),
    )(x2, w, b2)

    if (Mp, Cp) != (M, C):
        out = out[:M, :C]
    return out.reshape(orig_shape[:-1] + (C,))


if __name__ == "__main__":
    # Small shapes: batch=2, seq=8, hidden=32 (in_channels == out_channels == 32).
    in_channels = 32
    out_channels = 32

    key = jax.random.PRNGKey(0)
    kw, kx = jax.random.split(key)

    # Deterministic parameter init mirroring the module's __init__:
    #   weight = torch.rand(in_channels, out_channels), bias = zeros(out_channels)
    weight = jax.random.uniform(kw, (in_channels, out_channels), dtype=jnp.float32)
    bias = jnp.zeros((out_channels,), dtype=jnp.float32)

    x = jax.random.normal(kx, (2, 8, out_channels), dtype=jnp.float32)

    out = linear_pallas(x, weight, bias)
    out = jax.block_until_ready(out)

    # Reference check in plain JAX.
    ref = jnp.matmul(x, weight.T) + bias
    np.testing.assert_allclose(np.asarray(out), np.asarray(ref), rtol=1e-5, atol=1e-5)
    assert out.shape == (2, 8, in_channels)

    print("KERNEL_OK")
</pallas_src>

<mosaic_0001>
module attributes {stable_mosaic.version = 11 : i64} {
  func.func @_linear_kernel(%arg0: i32, %arg1: i32, %arg2: i32, %arg3: memref<16x128xf32, #tpu.memory_space<vmem>>, %arg4: memref<128x128xf32, #tpu.memory_space<vmem>>, %arg5: memref<1x128xf32, #tpu.memory_space<vmem>>, %arg6: memref<16x128xf32, #tpu.memory_space<vmem>>, %arg7: memref<16x128xf32, #tpu.memory_space<vmem>>) attributes {dimension_semantics = [#tpu.dimension_semantics<parallel>, #tpu.dimension_semantics<parallel>, #tpu.dimension_semantics<arbitrary>], iteration_bounds = array<i64: 1, 1, 1>, scalar_prefetch = 0 : i64, scratch_operands = 1 : i64, tpu.core_type = #tpu.core_type<tc>, window_params = [{transform_indices = @transform_0, window_bounds = array<i64: 16, 128>}, {transform_indices = @transform_1, window_bounds = array<i64: 128, 128>}, {transform_indices = @transform_2, window_bounds = array<i64: 1, 128>}, {transform_indices = @transform_3, window_bounds = array<i64: 16, 128>}]} {
    %c0_i32 = arith.constant 0 : i32
    %0 = arith.cmpi eq, %arg2, %c0_i32 : i32
    %1 = arith.extui %0 : i1 to i32
    %c0_i32_0 = arith.constant 0 : i32
    %2 = arith.cmpi ne, %1, %c0_i32_0 : i32
    scf.if %2 {
      %cst_10 = arith.constant 0.000000e+00 : f32
      %12 = vector.broadcast %cst_10 : f32 to vector<16x128xf32>
      %c0_11 = arith.constant 0 : index
      %c0_12 = arith.constant 0 : index
      %13 = vector.load %arg7[%c0_11, %c0_12] : memref<16x128xf32, #tpu.memory_space<vmem>>, vector<16x128xf32>
      tpu.vector_store %arg7[%c0_11, %c0_12], %12 {strides = array<i32>} : memref<16x128xf32, #tpu.memory_space<vmem>>, vector<16x128xf32>,
    } else {
    }
    %c0 = arith.constant 0 : index
    %c0_1 = arith.constant 0 : index
    %3 = vector.load %arg7[%c0, %c0_1] : memref<16x128xf32, #tpu.memory_space<vmem>>, vector<16x128xf32>
    %c0_2 = arith.constant 0 : index
    %c0_3 = arith.constant 0 : index
    %4 = vector.load %arg3[%c0_2, %c0_3] : memref<16x128xf32, #tpu.memory_space<vmem>>, vector<16x128xf32>
    %c0_4 = arith.constant 0 : index
    %c0_5 = arith.constant 0 : index
    %5 = vector.load %arg4[%c0_4, %c0_5] : memref<128x128xf32, #tpu.memory_space<vmem>>, vector<128x128xf32>
    %cst = arith.constant dense<0.000000e+00> : vector<16x128xf32>
    %6 = tpu.matmul %4, %5, %cst {dimension_numbers = #tpu.dot_dimension_numbers<[1], [1], [0], [0], [0, 0, 1, 0], [], []>} : vector<16x128xf32>, vector<128x128xf32>, vector<16x128xf32> -> vector<16x128xf32>
    %7 = arith.addf %3, %6 : vector<16x128xf32>
    %c0_6 = arith.constant 0 : index
    %c0_7 = arith.constant 0 : index
    %8 = vector.load %arg7[%c0_6, %c0_7] : memref<16x128xf32, #tpu.memory_space<vmem>>, vector<16x128xf32>
    tpu.vector_store %arg7[%c0_6, %c0_7], %7 {strides = array<i32>} : memref<16x128xf32, #tpu.memory_space<vmem>>, vector<16x128xf32>,
    %c0_i32_8 = arith.constant 0 : i32
    %9 = arith.cmpi eq, %arg2, %c0_i32_8 : i32
    %10 = arith.extui %9 : i1 to i32
    %c0_i32_9 = arith.constant 0 : i32
    %11 = arith.cmpi ne, %10, %c0_i32_9 : i32
    scf.if %11 {
      %c0_10 = arith.constant 0 : index
      %c0_11 = arith.constant 0 : index
      %12 = vector.load %arg7[%c0_10, %c0_11] : memref<16x128xf32, #tpu.memory_space<vmem>>, vector<16x128xf32>
      %c0_12 = arith.constant 0 : index
      %c0_13 = arith.constant 0 : index
      %13 = vector.load %arg5[%c0_12, %c0_13] : memref<1x128xf32, #tpu.memory_space<vmem>>, vector<1x128xf32>
      %14 = vector.broadcast %13 : vector<1x128xf32> to vector<16x128xf32>
      %15 = arith.addf %12, %14 : vector<16x128xf32>
      %c0_14 = arith.constant 0 : index
      %c0_15 = arith.constant 0 : index
      %16 = vector.load %arg6[%c0_14, %c0_15] : memref<16x128xf32, #tpu.memory_space<vmem>>, vector<16x128xf32>
      tpu.vector_store %arg6[%c0_14, %c0_15], %15 {strides = array<i32>} : memref<16x128xf32, #tpu.memory_space<vmem>>, vector<16x128xf32>,
    } else {
    }
    return
  }
  func.func @transform_0(%arg0: i32, %arg1: i32, %arg2: i32) -> (i32, i32) {
    %c0_i32 = arith.constant 0 : i32
    return %arg0, %arg2 : i32, i32
  }
  func.func @transform_1(%arg0: i32, %arg1: i32, %arg2: i32) -> (i32, i32) {
    %c0_i32 = arith.constant 0 : i32
    return %arg1, %arg2 : i32, i32
  }
  func.func @transform_2(%arg0: i32, %arg1: i32, %arg2: i32) -> (i32, i32) {
    %c0_i32 = arith.constant 0 : i32
    %c0_i32_0 = arith.constant 0 : i32
    return %c0_i32, %arg1 : i32, i32
  }
  func.func @transform_3(%arg0: i32, %arg1: i32, %arg2: i32) -> (i32, i32) {
    %c0_i32 = arith.constant 0 : i32
    return %arg0, %arg1 : i32, i32
  }
}

</mosaic_0001>

<bundles_post_ra>
// kernel: tpu_custom_call.1
= control target key start
LH: loop header
LB: loop body
LE: loop exit
PB: predicated region body
PF: predicated region fallthrough
CT: control target
= control target key end

     0   :  { %8 = vsyncpa [#allocation4], 0  ;;  %s418_s0 = inlined_call_operand.hbm [shape: f32[16,128], index: 0, kind: input, shape index: {}]   ;;  %s419_s1 = inlined_call_operand.hbm [shape: f32[128,128], index: 1, kind: input, shape index: {}]   ;;  %s420_s2 = inlined_call_operand.vmem [shape: f32[1,128], index: 2, kind: input, shape index: {}]   ;;  %s421_s3 = inlined_call_operand.hbm [shape: f32[16,128], index: 3, kind: output, shape index: {}]  }
   0x1   :  { %9 = vsyncpa [#allocation7], 0 }
   0x2   :  { %10 = vsyncpa [#allocation5], 0  ;;  %s345_s12 = smov [#allocation3]   ;;  %s273_s16 = scalar_lea.hbm %s418_s0, 256 }
   0x3   :  { %s16_s13 = sshll.u32 %s345_s12, 4  ;;  %p274_p0 = scmp.ne.s32.totalorder %s418_s0, %s273_s16  ;;  %s17_s13 = int_to_ptr.vmem [resolvable:$true] %s16_s13 }
   0x4   :  { %p277_p1 = scmp.lt.u32.totalorder %s273_s16, %s418_s0 }
   0x6   :  { %p279_p2 = pnand %p277_p1, %p274_p0 }
   0x8   :  { %282 = shalt.err (!%p279_p2)
}
   0x9   :  { %s283_s21 = scalar_lea.vmem %s17_s13, 256  ;;  %p288_p4 = scmp.lt.s32.totalorder %s17_s13, %s17_s13 }
   0xa   :  { %p284_p3 = scmp.ne.s32.totalorder %s17_s13, %s283_s21  ;;  %p289_p5 = scmp.lt.s32.totalorder %s283_s21, %s283_s21 }
   0xc   :  { %p290_p6 = por %p289_p5, %p288_p4 }
   0xe   :  { %p291_p7 = pnand %p290_p6, %p284_p3 }
  0x10   :  { %294 = shalt.err (!%p291_p7)
}
  0x11   :  { %s346_s22 = smov 128   ;;  %s347_s23 = smov 8  }
  0x12   :  { %22 = dma.hbm_to_vmem [thread:$0]  %s418_s0, 256, %s17_s13, [#allocation4], %s346_s22, %s346_s22, %s347_s23  }
  0x13   :  { %s348_s26 = smov [#allocation6]   ;;  %s295_s30 = scalar_lea.hbm %s419_s1, 2048 }
  0x14   :  { %s28_s27 = sshll.u32 %s348_s26, 4  ;;  %p296_p8 = scmp.ne.s32.totalorder %s419_s1, %s295_s30  ;;  %s29_s27 = int_to_ptr.vmem [resolvable:$true] %s28_s27 }
  0x15   :  { %p299_p9 = scmp.lt.u32.totalorder %s295_s30, %s419_s1 }
  0x17   :  { %p301_p10 = pnand %p299_p9, %p296_p8 }
  0x19   :  { %304 = shalt.err (!%p301_p10)
}
  0x1a   :  { %s305_s8 = scalar_lea.vmem %s29_s27, 2048  ;;  %p310_p12 = scmp.lt.s32.totalorder %s29_s27, %s29_s27 }
  0x1b   :  { %p306_p11 = scmp.ne.s32.totalorder %s29_s27, %s305_s8  ;;  %p311_p13 = scmp.lt.s32.totalorder %s305_s8, %s305_s8 }
  0x1d   :  { %p312_p0 = por %p311_p13, %p310_p12 }
  0x1f   :  { %p313_p1 = pnand %p312_p0, %p306_p11 }
  0x21   :  { %316 = shalt.err (!%p313_p1)
}
  0x22   :  { %34 = dma.hbm_to_vmem [thread:$0]  %s419_s1, 2048, %s29_s27, [#allocation7], %s346_s22, %s346_s22, %s347_s23  }
  0x23   :  { %339 = dma.done.wait [#allocation4], 256  }
  0x24   :  { %340 = vsyncadd [#allocation4], 4294967040 }
  0x25   :  { %341 = dma.done.wait [#allocation7], 2048  }
  0x26   :  { %342 = vsyncadd [#allocation7], 4294965248  ;;  %v53_v0 = vld [vmem:[#allocation6] sm:$0xff]  ;;  %v54_v1 = vld [vmem:[#allocation6 + $0x8] sm:$0xff]  ;;  %s349_s11 = smov [#allocation8]  }
  0x27   :  { %v55_v2 = vld [vmem:[#allocation6 + $0x10] sm:$0xff]  ;;  %v236_v3 = vpack.c.bf16 %v54_v1, %v53_v0  ;;  %v56_v4 = vld [vmem:[#allocation6 + $0x18] sm:$0xff]  ;;  %v57_v7 = vld [vmem:[#allocation6 + $0x20] sm:$0xff]  ;;  %s169_s12 = sshll.u32 %s349_s11, 4  ;;  %s170_s12 = int_to_ptr.vmem [resolvable:$true] %s169_s12 }
  0x28   :  { %v240_v5 = vpack.c.bf16 %v56_v4, %v55_v2  ;;  %v51_v6 = vld [vmem:[#allocation3] sm:$0xff]  ;;  %v58_v8 = vld [vmem:[#allocation6 + $0x28] sm:$0xff]  ;;  %v60_v11 = vld [vmem:[#allocation6 + $0x38] sm:$0xff]  ;;  %s317_s13 = scalar_lea.vmem %s170_s12, 256  ;;  %p322_p3 = scmp.lt.s32.totalorder %s170_s12, %s170_s12 }
  0x29   :  { %237 = vmatprep.subr.bf16.mxu0 %v236_v3  ;;  %233 = vmatprep.mubr.f32.mxu0 %v51_v6  ;;  %v244_v9 = vpack.c.bf16 %v58_v8, %v57_v7  ;;  %v59_v10 = vld [vmem:[#allocation6 + $0x30] sm:$0xff]  ;;  %v61_v13 = vld [vmem:[#allocation6 + $0x40] sm:$0xff]  ;;  %v62_v14 = vld [vmem:[#allocation6 + $0x48] sm:$0xff]  ;;  %p318_p2 = scmp.ne.s32.totalorder %s170_s12, %s317_s13  ;;  %p323_p4 = scmp.lt.s32.totalorder %s317_s13, %s317_s13 }
  0x2a   :  { %239 = vmatpush3.bf16.xpose.msra.mxu0 %v236_v3  ;;  %v248_v12 = vpack.c.bf16 %v60_v11, %v59_v10  ;;  %v252_v15 = vpack.c.bf16 %v62_v14, %v61_v13  ;;  %v63_v16 = vld [vmem:[#allocation6 + $0x50] sm:$0xff]  ;;  %v64_v17 = vld [vmem:[#allocation6 + $0x58] sm:$0xff]  ;;  %v65_v19 = vld [vmem:[#allocation6 + $0x60] sm:$0xff] }
  0x2b   :  { %241 = vmatprep.subr.bf16.mxu0 %v240_v5  ;;  %v256_v18 = vpack.c.bf16 %v64_v17, %v63_v16  ;;  %v66_v20 = vld [vmem:[#allocation6 + $0x68] sm:$0xff]  ;;  %v67_v22 = vld [vmem:[#allocation6 + $0x70] sm:$0xff]  ;;  %v68_v23 = vld [vmem:[#allocation6 + $0x78] sm:$0xff]  ;;  %p324_p5 = por %p323_p4, %p322_p3 }
  0x2c   :  { %v260_v21 = vpack.c.bf16 %v66_v20, %v65_v19  ;;  %v264_v24 = vpack.c.bf16 %v68_v23, %v67_v22  ;;  %v52_v25 = vld [vmem:[#allocation3 + $0x8] sm:$0xff]  ;;  %v182_v26 = vld [vmem:[%s420_s2] ss:$0 sm:$0xff] }
  0x2d   :  { %p325_p6 = pnand %p324_p5, %p318_p2 }
  0x32   :  { %243 = vmatpush3.bf16.xpose.msra.mxu0 %v240_v5 }
  0x33   :  { %245 = vmatprep.subr.bf16.mxu0 %v244_v9 }
  0x3a   :  { %247 = vmatpush3.bf16.xpose.msra.mxu0 %v244_v9 }
  0x3b   :  { %249 = vmatprep.subr.bf16.mxu0 %v248_v12 }
  0x42   :  { %251 = vmatpush3.bf16.xpose.msra.mxu0 %v248_v12 }
  0x43   :  { %253 = vmatprep.subr.bf16.mxu0 %v252_v15 }
  0x4a   :  { %255 = vmatpush3.bf16.xpose.msra.mxu0 %v252_v15 }
  0x4b   :  { %257 = vmatprep.subr.bf16.mxu0 %v256_v18 }
  0x52   :  { %259 = vmatpush3.bf16.xpose.msra.mxu0 %v256_v18 }
  0x53   :  { %261 = vmatprep.subr.bf16.mxu0 %v260_v21 }
  0x5a   :  { %263 = vmatpush3.bf16.xpose.msra.mxu0 %v260_v21 }
  0x5b   :  { %265 = vmatprep.subr.bf16.mxu0 %v264_v24 }
  0x62   :  { %267 = vmatpush3.bf16.xpose.msra.mxu0 %v264_v24 }
  0x69   :  { %234 = vmatmul.mubr.f32.vlgmr.msra.gmra.mrb[0].mxu0 %v52_v25 }
 0x13c   :  { %v235_v27 = vpop.f32.mrb[0].mxu0 }
 0x13d   :  { %v161_v28 = vadd.f32 %v235_v27, %v182_v26  ;;  %v135_v29 = vpop.f32.mrb[1].mxu0 }
 0x13e   :  { %v160_v30 = vadd.f32 %v182_v26, %v135_v29 }
 0x13f   :  { %163 = vst [vmem:[#allocation8 + $0x8] sm:$0xff] %v161_v28 }
 0x140   :  { %162 = vst [vmem:[#allocation8] sm:$0xff] %v160_v30 }
 0x141   :  { %328 = shalt.err (!%p325_p6)
}
 0x142   :  { %s329_s2 = scalar_lea.hbm %s421_s3, 256 }
 0x143   :  { %p330_p7 = scmp.ne.s32.totalorder %s421_s3, %s329_s2  ;;  %p333_p8 = scmp.lt.u32.totalorder %s329_s2, %s421_s3 }
 0x145   :  { %p335_p9 = pnand %p333_p8, %p330_p7 }
 0x147   :  { %338 = shalt.err (!%p335_p9)
}
 0x148   :  { %175 = dma.vmem_to_hbm [thread:$0]  %s170_s12, 256, %s421_s3, [#allocation5], %s346_s22, %s346_s22, %s347_s23  }
 0x149   :  { %343 = dma.done.wait [#allocation5], 256  }
 0x14a   :  { %344 = vsyncadd [#allocation5], 4294967040 }
 0x14b   :  { %179 = vsyncpa [#allocation4], 1 }
 0x14c   :  { %180 = vsyncpa [#allocation7], 1 }
 0x14d   :  { %181 = vsyncpa [#allocation5], 1 }

</bundles_post_ra>
